<compile_context>
chip_gen: v6e
topology: v6e:2x2x1
jax: 0.10.0
libtpu: 0.0.40
codegen_flags: <defaults>
</compile_context>

<pallas_src>
import jax
import jax.numpy as jnp
from jax.experimental import pallas as pl
from jax.experimental.pallas import tpu as pltpu


# ---------------------------------------------------------------------------
# Kernel
# ---------------------------------------------------------------------------
def gfn_mlp_kernel(xc_ref, w1_ref, w2_ref, w1f_ref, w2f_ref, b_ref, o_ref):
    """One batch tile of the fused 3-trunk MLP.

    xc_ref : (TILE_B, state_dim + cond_dim)      f32   -- [x | c]
    w1_ref : (Din, h_s + h_c)   block-diag(w1s, w1c)
    w2_ref : (h_s + h_c, d_s + d_c) block-diag(w2s, w2c)
    w1f_ref: (d_s + d_c, h_f)   final layer 1 (acts on the implicit concat)
    w2f_ref: (1, h_f)           final layer 2, stored as a row
    b_ref  : (4, maxw)          packed biases: [b1 | b2 | b1f | b2f] (zero padded)
    o_ref  : (TILE_B, 1)        f32
    """
    H = w1_ref.shape[1]     # h_s + h_c
    D = w2_ref.shape[1]     # d_s + d_c
    HF = w1f_ref.shape[1]   # h_f

    xc = xc_ref[...]
    biases = b_ref[...]

    # Trunk layer 1 (both trunks fused via block-diagonal weights): Linear -> ReLU
    h = jnp.maximum(
        jnp.dot(xc, w1_ref[...], preferred_element_type=jnp.float32)
        + biases[0:1, :H],
        0.0,
    )
    # Trunk layer 2: result is already cat([state_out, cond_out], -1)
    h = jnp.dot(h, w2_ref[...], preferred_element_type=jnp.float32) + biases[1:2, :D]

    # Final module layer 1: Linear -> ReLU
    h = jnp.maximum(
        jnp.dot(h, w1f_ref[...], preferred_element_type=jnp.float32)
        + biases[2:3, :HF],
        0.0,
    )

    # Final module layer 2 -> scalar: VPU multiply + XLU lane reduce (no MXU pass
    # for a single output column), then add the scalar bias.
    out = jnp.sum(h * w2f_ref[...], axis=-1, keepdims=True) + biases[3:4, 0:1]

    o_ref[...] = out.astype(o_ref.dtype)


# ---------------------------------------------------------------------------
# Wrapper
# ---------------------------------------------------------------------------
def _round_up(x: int, m: int) -> int:
    return (x + m - 1) // m * m


def conditional_scalar_estimator(
    x, c, packed, *, tile_b: int = 128, vmem_limit_bytes: int = 32 * 1024 * 1024
):
    """x: (B, state_dim) f32, c: (B, cond_dim) f32 -> (B, 1) f32."""
    B = x.shape[0]
    xc = jnp.concatenate([x, c], axis=-1).astype(jnp.float32)
    din = xc.shape[1]

    # Batch tile: multiple of 8 sublanes; pad B up to a multiple of the tile.
    tb = min(tile_b, _round_up(B, 8))
    bp = _round_up(B, tb)
    if bp != B:
        xc = jnp.pad(xc, ((0, bp - B), (0, 0)))

    w1 = packed["w1"]
    w2 = packed["w2"]
    w1f = packed["w1f"]
    w2f_row = packed["w2f_row"]
    b_all = packed["b_all"]

    def const_spec(shape):
        # Constant block index -> weights DMA'd once, VMEM-resident across the grid.
        return pl.BlockSpec(shape, lambda i: (0, 0))

    out = pl.pallas_call(
        gfn_mlp_kernel,
        out_shape=jax.ShapeDtypeStruct((bp, 1), jnp.float32),
        grid=(bp // tb,),
        in_specs=[
            pl.BlockSpec((tb, din), lambda i: (i, 0)),   # batch-tiled activations
            const_spec(w1.shape),
            const_spec(w2.shape),
            const_spec(w1f.shape),
            const_spec(w2f_row.shape),
            const_spec(b_all.shape),
        ],
        out_specs=pl.BlockSpec((tb, 1), lambda i: (i, 0)),
        compiler_params=pltpu.CompilerParams(
            dimension_semantics=("parallel",),           # shards batch tiles on v7x's 2 TCs
            vmem_limit_bytes=vmem_limit_bytes,
        ),
    )(xc, w1, w2, w1f, w2f_row, b_all)

    return out[:B]


# ---------------------------------------------------------------------------
# Parameter construction (PyTorch Linear init, stored transposed: y = x @ W + b)
# ---------------------------------------------------------------------------
def make_raw_params(key, state_dim, cond_dim, h_s, d_s, h_c, d_c, h_f):
    ks = jax.random.split(key, 6)

    def lin(k, fan_in, fan_out):
        kw, kb = jax.random.split(k)
        scale = 1.0 / jnp.sqrt(fan_in)
        w = jax.random.uniform(kw, (fan_in, fan_out), jnp.float32, -scale, scale)
        b = jax.random.uniform(kb, (1, fan_out), jnp.float32, -scale, scale)
        return w, b

    w1s, b1s = lin(ks[0], state_dim, h_s)
    w2s, b2s = lin(ks[1], h_s, d_s)
    w1c, b1c = lin(ks[2], cond_dim, h_c)
    w2c, b2c = lin(ks[3], h_c, d_c)
    w1f, b1f = lin(ks[4], d_s + d_c, h_f)
    w2f, b2f = lin(ks[5], h_f, 1)

    return dict(
        w1s=w1s, b1s=b1s, w2s=w2s, b2s=b2s,
        w1c=w1c, b1c=b1c, w2c=w2c, b2c=b2c,
        w1f=w1f, b1f=b1f, w2f=w2f, b2f=b2f,
    )


def pack_params(raw, state_dim, cond_dim, h_s, d_s, h_c, d_c, h_f):
    """Pack per-layer params into block-diagonal weights + one bias buffer."""
    # Block-diagonal trunk weights (off-diagonal blocks are exact zeros).
    w1 = jnp.zeros((state_dim + cond_dim, h_s + h_c), jnp.float32)
    w1 = w1.at[:state_dim, :h_s].set(raw["w1s"]).at[state_dim:, h_s:].set(raw["w1c"])

    w2 = jnp.zeros((h_s + h_c, d_s + d_c), jnp.float32)
    w2 = w2.at[:h_s, :d_s].set(raw["w2s"]).at[h_s:, d_s:].set(raw["w2c"])

    w1f = raw["w1f"]                      # (d_s + d_c, h_f): already the concat layout
    w2f_row = raw["w2f"].T                # (1, h_f)

    maxw = max(h_s + h_c, d_s + d_c, h_f, 1)
    b_all = jnp.zeros((4, maxw), jnp.float32)
    b_all = b_all.at[0, : h_s + h_c].set(
        jnp.concatenate([raw["b1s"][0], raw["b1c"][0]])
    )
    b_all = b_all.at[1, : d_s + d_c].set(
        jnp.concatenate([raw["b2s"][0], raw["b2c"][0]])
    )
    b_all = b_all.at[2, :h_f].set(raw["b1f"][0])
    b_all = b_all.at[3, 0].set(raw["b2f"][0, 0])

    return dict(w1=w1, w2=w2, w1f=w1f, w2f_row=w2f_row, b_all=b_all)


# ---------------------------------------------------------------------------
# Pure-JAX reference (un-fused, mirrors the PyTorch module structure)
# ---------------------------------------------------------------------------
def reference(x, c, p):
    hs = jnp.maximum(x @ p["w1s"] + p["b1s"], 0.0) @ p["w2s"] + p["b2s"]
    hc = jnp.maximum(c @ p["w1c"] + p["b1c"], 0.0) @ p["w2c"] + p["b2c"]
    z = jnp.concatenate([hs, hc], axis=-1)
    hf = jnp.maximum(z @ p["w1f"] + p["b1f"], 0.0)
    return hf @ p["w2f"] + p["b2f"]


if __name__ == "__main__":
    # Small but grid-exercising shapes: B=200 -> padded to 256, grid of 2 batch tiles.
    B, state_dim, cond_dim = 200, 16, 8
    h_s, d_s = 32, 32          # state_module: 16 -> 32 -> 32
    h_c, d_c = 32, 16          # conditioning_module: 8 -> 32 -> 16
    h_f = 32                   # final_module: (32+16) -> 32 -> 1

    key = jax.random.PRNGKey(0)
    kx, kc, kp = jax.random.split(key, 3)
    x = jax.random.normal(kx, (B, state_dim), jnp.float32)
    c = jax.random.normal(kc, (B, cond_dim), jnp.float32)

    raw = make_raw_params(kp, state_dim, cond_dim, h_s, d_s, h_c, d_c, h_f)
    packed = pack_params(raw, state_dim, cond_dim, h_s, d_s, h_c, d_c, h_f)

    out = conditional_scalar_estimator(x, c, packed)
    out = jax.block_until_ready(out)

    ref = reference(x, c, raw)
    assert out.shape == (B, 1) and out.dtype == jnp.float32
    assert jnp.allclose(out, ref, atol=1e-4, rtol=1e-4), float(
        jnp.max(jnp.abs(out - ref))
    )

    print("KERNEL_OK")
</pallas_src>

<mosaic_0001>
module attributes {stable_mosaic.version = 11 : i64} {
  func.func @gfn_mlp_kernel(%arg0: i32, %arg1: memref<128x24xf32, #tpu.memory_space<vmem>>, %arg2: memref<24x64xf32, #tpu.memory_space<vmem>>, %arg3: memref<64x48xf32, #tpu.memory_space<vmem>>, %arg4: memref<48x32xf32, #tpu.memory_space<vmem>>, %arg5: memref<1x32xf32, #tpu.memory_space<vmem>>, %arg6: memref<4x64xf32, #tpu.memory_space<vmem>>, %arg7: memref<128x1xf32, #tpu.memory_space<vmem>>) attributes {dimension_semantics = [#tpu.dimension_semantics<parallel>], iteration_bounds = array<i64: 2>, scalar_prefetch = 0 : i64, scratch_operands = 0 : i64, tpu.core_type = #tpu.core_type<tc>, window_params = [{transform_indices = @transform_0, window_bounds = array<i64: 128, 24>}, {pipeline_mode = #tpu.pipeline_mode<synchronous>, transform_indices = @transform_1, window_bounds = array<i64: 24, 64>}, {pipeline_mode = #tpu.pipeline_mode<synchronous>, transform_indices = @transform_2, window_bounds = array<i64: 64, 48>}, {pipeline_mode = #tpu.pipeline_mode<synchronous>, transform_indices = @transform_3, window_bounds = array<i64: 48, 32>}, {pipeline_mode = #tpu.pipeline_mode<synchronous>, transform_indices = @transform_4, window_bounds = array<i64: 1, 32>}, {pipeline_mode = #tpu.pipeline_mode<synchronous>, transform_indices = @transform_5, window_bounds = array<i64: 4, 64>}, {transform_indices = @transform_6, window_bounds = array<i64: 128, 1>}]} {
    %c0 = arith.constant 0 : index
    %c0_0 = arith.constant 0 : index
    %0 = vector.load %arg1[%c0, %c0_0] : memref<128x24xf32, #tpu.memory_space<vmem>>, vector<128x24xf32>
    %c0_1 = arith.constant 0 : index
    %c0_2 = arith.constant 0 : index
    %1 = vector.load %arg6[%c0_1, %c0_2] : memref<4x64xf32, #tpu.memory_space<vmem>>, vector<4x64xf32>
    %c0_3 = arith.constant 0 : index
    %c0_4 = arith.constant 0 : index
    %2 = vector.load %arg2[%c0_3, %c0_4] : memref<24x64xf32, #tpu.memory_space<vmem>>, vector<24x64xf32>
    %cst = arith.constant dense<0.000000e+00> : vector<128x64xf32>
    %3 = tpu.matmul %0, %2, %cst {dimension_numbers = #tpu.dot_dimension_numbers<[1], [0], [0], [1], [0, 0, 1, 1], [], []>} : vector<128x24xf32>, vector<24x64xf32>, vector<128x64xf32> -> vector<128x64xf32>
    %4 = vector.extract_strided_slice %1 {offsets = [0, 0], sizes = [1, 64], strides = [1, 1]} : vector<4x64xf32> to vector<1x64xf32>
    %5 = vector.broadcast %4 : vector<1x64xf32> to vector<128x64xf32>
    %6 = arith.addf %3, %5 : vector<128x64xf32>
    %cst_5 = arith.constant 0.000000e+00 : f32
    %7 = vector.broadcast %cst_5 : f32 to vector<128x64xf32>
    %8 = arith.maximumf %6, %7 : vector<128x64xf32>
    %c0_6 = arith.constant 0 : index
    %c0_7 = arith.constant 0 : index
    %9 = vector.load %arg3[%c0_6, %c0_7] : memref<64x48xf32, #tpu.memory_space<vmem>>, vector<64x48xf32>
    %cst_8 = arith.constant dense<0.000000e+00> : vector<128x48xf32>
    %10 = tpu.matmul %8, %9, %cst_8 {dimension_numbers = #tpu.dot_dimension_numbers<[1], [0], [0], [1], [0, 0, 1, 1], [], []>} : vector<128x64xf32>, vector<64x48xf32>, vector<128x48xf32> -> vector<128x48xf32>
    %11 = vector.extract_strided_slice %1 {offsets = [1, 0], sizes = [1, 48], strides = [1, 1]} : vector<4x64xf32> to vector<1x48xf32>
    %12 = vector.broadcast %11 : vector<1x48xf32> to vector<128x48xf32>
    %13 = arith.addf %10, %12 : vector<128x48xf32>
    %c0_9 = arith.constant 0 : index
    %c0_10 = arith.constant 0 : index
    %14 = vector.load %arg4[%c0_9, %c0_10] : memref<48x32xf32, #tpu.memory_space<vmem>>, vector<48x32xf32>
    %cst_11 = arith.constant dense<0.000000e+00> : vector<128x32xf32>
    %15 = tpu.matmul %13, %14, %cst_11 {dimension_numbers = #tpu.dot_dimension_numbers<[1], [0], [0], [1], [0, 0, 1, 1], [], []>} : vector<128x48xf32>, vector<48x32xf32>, vector<128x32xf32> -> vector<128x32xf32>
    %16 = vector.extract_strided_slice %1 {offsets = [2, 0], sizes = [1, 32], strides = [1, 1]} : vector<4x64xf32> to vector<1x32xf32>
    %17 = vector.broadcast %16 : vector<1x32xf32> to vector<128x32xf32>
    %18 = arith.addf %15, %17 : vector<128x32xf32>
    %cst_12 = arith.constant 0.000000e+00 : f32
    %19 = vector.broadcast %cst_12 : f32 to vector<128x32xf32>
    %20 = arith.maximumf %18, %19 : vector<128x32xf32>
    %c0_13 = arith.constant 0 : index
    %c0_14 = arith.constant 0 : index
    %21 = vector.load %arg5[%c0_13, %c0_14] : memref<1x32xf32, #tpu.memory_space<vmem>>, vector<1x32xf32>
    %22 = vector.broadcast %21 : vector<1x32xf32> to vector<128x32xf32>
    %23 = arith.mulf %20, %22 : vector<128x32xf32>
    %cst_15 = arith.constant dense<0.000000e+00> : vector<128xf32>
    %24 = vector.multi_reduction <add>, %23, %cst_15 [1] : vector<128x32xf32> to vector<128xf32>
    %25 = vector.shape_cast %24 : vector<128xf32> to vector<128x1xf32>
    %26 = vector.extract_strided_slice %1 {offsets = [3, 0], sizes = [1, 1], strides = [1, 1]} : vector<4x64xf32> to vector<1x1xf32>
    %27 = vector.broadcast %26 : vector<1x1xf32> to vector<128x1xf32>
    %28 = arith.addf %25, %27 : vector<128x1xf32>
    %c0_16 = arith.constant 0 : index
    %c0_17 = arith.constant 0 : index
    %29 = vector.load %arg7[%c0_16, %c0_17] : memref<128x1xf32, #tpu.memory_space<vmem>>, vector<128x1xf32>
    tpu.vector_store %arg7[%c0_16, %c0_17], %28 {strides = array<i32>} : memref<128x1xf32, #tpu.memory_space<vmem>>, vector<128x1xf32>,
    return
  }
  func.func @transform_0(%arg0: i32) -> (i32, i32) {
    %c0_i32 = arith.constant 0 : i32
    %c0_i32_0 = arith.constant 0 : i32
    return %arg0, %c0_i32 : i32, i32
  }
  func.func @transform_1(%arg0: i32) -> (i32, i32) {
    %c0_i32 = arith.constant 0 : i32
    %c0_i32_0 = arith.constant 0 : i32
    %c0_i32_1 = arith.constant 0 : i32
    return %c0_i32, %c0_i32_0 : i32, i32
  }
  func.func @transform_2(%arg0: i32) -> (i32, i32) {
    %c0_i32 = arith.constant 0 : i32
    %c0_i32_0 = arith.constant 0 : i32
    %c0_i32_1 = arith.constant 0 : i32
    return %c0_i32, %c0_i32_0 : i32, i32
  }
  func.func @transform_3(%arg0: i32) -> (i32, i32) {
    %c0_i32 = arith.constant 0 : i32
    %c0_i32_0 = arith.constant 0 : i32
    %c0_i32_1 = arith.constant 0 : i32
    return %c0_i32, %c0_i32_0 : i32, i32
  }
  func.func @transform_4(%arg0: i32) -> (i32, i32) {
    %c0_i32 = arith.constant 0 : i32
    %c0_i32_0 = arith.constant 0 : i32
    %c0_i32_1 = arith.constant 0 : i32
    return %c0_i32, %c0_i32_0 : i32, i32
  }
  func.func @transform_5(%arg0: i32) -> (i32, i32) {
    %c0_i32 = arith.constant 0 : i32
    %c0_i32_0 = arith.constant 0 : i32
    %c0_i32_1 = arith.constant 0 : i32
    return %c0_i32, %c0_i32_0 : i32, i32
  }
  func.func @transform_6(%arg0: i32) -> (i32, i32) {
    %c0_i32 = arith.constant 0 : i32
    %c0_i32_0 = arith.constant 0 : i32
    return %arg0, %c0_i32 : i32, i32
  }
}

</mosaic_0001>

<bundles_post_ra>
// kernel: tpu_custom_call.1
= control target key start
LH: loop header
LB: loop body
LE: loop exit
PB: predicated region body
PF: predicated region fallthrough
CT: control target
= control target key end

     0   :  { %s1368_s21 = smov 0   ;;  %s1613_s0 = inlined_call_operand.vmem [shape: f32[256,24], index: 0, kind: input, shape index: {}]   ;;  %s1614_s1 = inlined_call_operand.vmem [shape: f32[24,64], index: 1, kind: input, shape index: {}]   ;;  %s1615_s2 = inlined_call_operand.vmem [shape: f32[64,48], index: 2, kind: input, shape index: {}]   ;;  %s1616_s3 = inlined_call_operand.vmem [shape: f32[48,32], index: 3, kind: input, shape index: {}]   ;;  %s1617_s4 = inlined_call_operand.vmem [shape: f32[1,32], index: 4, kind: input, shape index: {}]   ;;  %s1618_s5 = inlined_call_operand.vmem [shape: f32[4,64], index: 5, kind: input, shape index: {}]   ;;  %s1619_s6 = inlined_call_operand.vmem [shape: f32[256,1], index: 6, kind: output, shape index: {}]  }
   0x1 LB: > { %s1080_s22 = sadd.s32 4294967295, %s1331_s21   ;;  %p1084_p0 = scmp.ge.s32.totalorder %s1331_s21, 1  ;;  %s1331_s21 = sphi %s1368_s21, %s16_s21  }
   0x2   : > { %p213_p1 = scmp.lt.s32.totalorder %s1331_s21, 3 }
   0x4   : > { %p214_p2 = pnand %p1084_p0, %p213_p1 }
   0x5   : > { %s1085_s27 = sshll.u32 (!%p214_p2), %s1080_s22, 4 }
   0x6   : > { %217 = sbr.rel (%p214_p2) target bundleno = 790 (0x316), region = 44  ;;  %p244_p3 = scmp.lt.s32.totalorder (!%p214_p2), %s1085_s27, 31 }
   0xb   : > { %v274_v0 = vld [vmem:[%s1614_s1 + $0x10] sm:$0xff]  ;;  %v273_v1 = vld [vmem:[%s1614_s1 + $0x8] sm:$0xff]  ;;  %v272_v2 = vld [vmem:[%s1614_s1] sm:$0xff]  ;;  %s1621_s27 = smov (!%p244_p3, %s1085_s27), 31  ;;  %vm279_vm0 = vcmask 195584   ;;  %v275_v31 = vlaneseq  ;;  %vm501_vm1 = vcmask 523264  }
   0xc   : > { %1205 = vmatprep.subr.mxu0 %v274_v0  ;;  %1311 = vmatprep.subr.mxu1 %v274_v0  ;;  %v496_v3 = vld [vmem:[%s1615_s2 + $0x38] sm:$0xff]  ;;  %s1086_s8 = sshll.u32 %s1621_s27, 3  ;;  %v495_v8 = vld [vmem:[%s1615_s2 + $0x30] sm:$0xff]  ;;  %v494_v14 = vld [vmem:[%s1615_s2 + $0x28] sm:$0xff]  ;;  %vm705_vm2 = vcmask 392192   ;;  %vm938_vm3 = vcmask 261120  }
   0xd   : > { %1206 = vmatpush3.msra.mxu0 %v274_v0  ;;  %1314 = vmatpush3.msra.mxu1 %v274_v0  ;;  %s1396_s11 = scalar_lea.vmem %s1613_s0, %s1086_s8  ;;  %v493_v17 = vld [vmem:[%s1615_s2 + $0x20] sm:$0xff]  ;;  %v492_v20 = vld [vmem:[%s1615_s2 + $0x18] sm:$0xff]  ;;  %v491_v24 = vld [vmem:[%s1615_s2 + $0x10] sm:$0xff]  ;;  %v1463_v32 = vshrl.u32 %v275_v31, 7  ;;  %s1576_s24 = scalar_lea.vmem %s1619_s6, %s1086_s8  ;;  %vm1007_vm4 = vcmask 7168  }
   0xe   : > { %1207 = vmatprep.subr.mxu0 %v273_v1  ;;  %1312 = vmatprep.subr.mxu1 %v273_v1  ;;  %v255_v4 = vld [vmem:[%s1396_s11] sm:$0xff]  ;;  %v256_v5 = vld [vmem:[%s1396_s11 + $0x8] sm:$0xff]  ;;  %v257_v6 = vld [vmem:[%s1396_s11 + $0x10] sm:$0xff] }
   0xf   : > { %1208 = vmatpush3.msra.mxu0 %v273_v1  ;;  %1315 = vmatpush3.msra.mxu1 %v273_v1  ;;  %v263_v7 = vld [vmem:[%s1396_s11 + $0x40] sm:$0xff]  ;;  %v258_v9 = vld [vmem:[%s1396_s11 + $0x18] sm:$0xff]  ;;  %v264_v10 = vld [vmem:[%s1396_s11 + $0x48] sm:$0xff]  ;;  %v277_v33 = vsub.s32 0, %v1463_v32 }
  0x10   : > { %1209 = vmatprep.subr.mxu0 %v272_v2  ;;  %1313 = vmatprep.subr.mxu1 %v272_v2  ;;  %v265_v11 = vld [vmem:[%s1396_s11 + $0x50] sm:$0xff]  ;;  %v259_v12 = vld [vmem:[%s1396_s11 + $0x20] sm:$0xff]  ;;  %v266_v13 = vld [vmem:[%s1396_s11 + $0x58] sm:$0xff] }
  0x11   : > { %1210 = vmatpush3.msra.mxu0 %v272_v2  ;;  %1316 = vmatpush3.msra.mxu1 %v272_v2  ;;  %v267_v15 = vld [vmem:[%s1396_s11 + $0x60] sm:$0xff]  ;;  %v260_v16 = vld [vmem:[%s1396_s11 + $0x28] sm:$0xff]  ;;  %v261_v18 = vld [vmem:[%s1396_s11 + $0x30] sm:$0xff] }
  0x12   : > { %1235 = vmatprep.subr.mxu1 %v496_v3  ;;  %1211 = vmatprep.mubr.msk.f32.mxu0 %vm279_vm0, %v255_v4  ;;  %v268_v19 = vld [vmem:[%s1396_s11 + $0x68] sm:$0xff]  ;;  %v269_v21 = vld [vmem:[%s1396_s11 + $0x70] sm:$0xff]  ;;  %v262_v22 = vld [vmem:[%s1396_s11 + $0x38] sm:$0xff] }
  0x13   : > { %1212 = vmatmul.mubr.msk.f32.vlgmr.msra.gmra.mxu0 %vm279_vm0, %v256_v5  ;;  %1223 = vmatprep.mubr.msk.f32.mxu1 %vm279_vm0, %v263_v7  ;;  %v270_v23 = vld [vmem:[%s1396_s11 + $0x78] sm:$0xff]  ;;  %v490_v25 = vld [vmem:[%s1615_s2 + $0x8] sm:$0xff]  ;;  %v489_v26 = vld [vmem:[%s1615_s2] sm:$0xff] }
  0x14   : > { %1214 = vmatprep.mubr.msk.f32.mxu0 %vm279_vm0, %v257_v6  ;;  %1224 = vmatmul.mubr.msk.f32.vlgmr.msra.gmra.mxu1 %vm279_vm0, %v264_v10  ;;  %v700_v27 = vld [vmem:[%s1616_s3 + $0x28] sm:$0xff]  ;;  %v699_v28 = vld [vmem:[%s1616_s3 + $0x20] sm:$0xff]  ;;  %v698_v29 = vld [vmem:[%s1616_s3 + $0x18] sm:$0xff] }
  0x15   : > { %1226 = vmatprep.mubr.msk.f32.mxu1 %vm279_vm0, %v265_v11  ;;  %1236 = vmatpush3.msra.mxu1 %v496_v3  ;;  %v697_v30 = vld [vmem:[%s1616_s3 + $0x10] sm:$0xff]  ;;  %v1469_v34 = vld [vmem:[%s1618_s5] sm:$0xf] }
  0x16   : > { %1237 = vmatprep.subr.mxu1 %v495_v8  ;;  %1275 = vmatprep.subr.mxu0 %v700_v27  ;;  %v278_v35 = vrot.slane %v1469_v34, %v277_v33 }
  0x17   : > { %1215 = vmatmul.mubr.msk.f32.gmra.mxu0 %vm279_vm0, %v258_v9  ;;  %1238 = vmatpush3.msra.mxu1 %v495_v8 }
  0x18   : > { %1217 = vmatprep.mubr.msk.f32.mxu0 %vm279_vm0, %v259_v12  ;;  %1227 = vmatmul.mubr.msk.f32.gmra.mxu1 %vm279_vm0, %v266_v13 }
  0x19   : > { %1239 = vmatprep.subr.mxu1 %v494_v14  ;;  %1229 = vmatprep.mubr.msk.f32.mxu1 %vm279_vm0, %v267_v15 }
  0x1a   : > { %1240 = vmatpush3.msra.mxu1 %v494_v14  ;;  %1276 = vmatpush3.msra.mxu0 %v700_v27 }
  0x1b   : > { %1218 = vmatmul.mubr.msk.f32.gmra.mxu0 %vm279_vm0, %v260_v16  ;;  %1241 = vmatprep.subr.mxu1 %v493_v17 }
  0x1c   : > { %1220 = vmatprep.mubr.msk.f32.mxu0 %vm279_vm0, %v261_v18  ;;  %1242 = vmatpush3.msra.mxu1 %v493_v17 }
  0x1d   : > { %1230 = vmatmul.mubr.msk.f32.gmra.mxu1 %vm279_vm0, %v268_v19  ;;  %1243 = vmatprep.subr.mxu1 %v492_v20 }
  0x1e   : > { %1232 = vmatprep.mubr.msk.f32.mxu1 %vm279_vm0, %v269_v21  ;;  %1244 = vmatpush3.msra.mxu1 %v492_v20  ;;  %v696_v20 = vld [vmem:[%s1616_s3 + $0x8] sm:$0xff]  ;;  %v695_v21 = vld [vmem:[%s1616_s3] sm:$0xff] }
  0x1f   : > { %1221 = vmatmul.mubr.msk.f32.gmra.mxu0 %vm279_vm0, %v262_v22  ;;  %1245 = vmatprep.subr.mxu1 %v491_v24  ;;  %v499_v22 = vsub.s32 1, %v1463_v32 }
  0x20   : > { %1246 = vmatpush3.msra.mxu1 %v491_v24  ;;  %1277 = vmatprep.subr.mxu0 %v699_v28 }
  0x21   : > { %1233 = vmatmul.mubr.msk.f32.gmra.mxu1 %vm279_vm0, %v270_v23  ;;  %1247 = vmatprep.subr.mxu1 %v490_v25  ;;  %v500_v23 = vrot.slane %v1469_v34, %v499_v22 }
  0x22   : > { %1248 = vmatpush3.msra.mxu1 %v490_v25  ;;  %1278 = vmatpush3.msra.mxu0 %v699_v28 }
  0x23   : > { %1249 = vmatprep.subr.mxu1 %v489_v26  ;;  %1279 = vmatprep.subr.mxu0 %v698_v29 }
  0x24   : > { %1250 = vmatpush3.msra.mxu1 %v489_v26  ;;  %1280 = vmatpush3.msra.mxu0 %v698_v29 }
  0x25   : > { %1281 = vmatprep.subr.mxu0 %v697_v30 }
  0x26   : > { %1282 = vmatpush3.msra.mxu0 %v697_v30 }
  0x27   : > { %1283 = vmatprep.subr.mxu0 %v696_v20 }
  0x28   : > { %1284 = vmatpush3.msra.mxu0 %v696_v20 }
  0x29   : > { %1285 = vmatprep.subr.mxu0 %v695_v21 }
  0x2a   : > { %1286 = vmatpush3.msra.mxu0 %v695_v21 }
  0xd3   : > { %v1213_v36 = vpop.f32.mrf.mxu0 }
  0xd4   : > { %v400_v37 = vadd.f32 %v1213_v36, %v278_v35  ;;  %v1225_v39 = vpop.f32.mrf.mxu1 }
  0xd5   : > { %v394_v38 = vpop.f32.mrf.mxu0  ;;  %v440_v2 = vadd.f32 %v1225_v39, %v278_v35 }
  0xd6   : > { %v395_v40 = vadd.f32 %v394_v38, %v278_v35  ;;  %v434_v42 = vpop.f32.mrf.mxu1  ;;  %v474_v44 = vmax.f32 %v400_v37, 0.0 }
  0xd7   : > { %v1216_v41 = vpop.f32.mrf.mxu0  ;;  %v435_v61 = vadd.f32 %v434_v42, %v278_v35  ;;  %v482_v7 = vmax.f32 %v440_v2, 0.0 }
  0xd8   : > { %v473_v43 = vmax.f32 %v395_v40, 0.0  ;;  %v410_v45 = vadd.f32 %v1216_v41, %v278_v35  ;;  %v1228_v47 = vpop.f32.mrf.mxu1 }
  0xd9   : > { %v404_v46 = vpop.f32.mrf.mxu0  ;;  %v481_v4 = vmax.f32 %v435_v61, 0.0  ;;  %v450_v8 = vadd.f32 %v1228_v47, %v278_v35 }
  0xda   : > { %v405_v48 = vadd.f32 %v404_v46, %v278_v35  ;;  %1251 = vmatprep.mubr.msk.f32.mxu1 %vm501_vm1, %v473_v43  ;;  %v444_v50 = vpop.f32.mrf.mxu1  ;;  %v476_v53 = vmax.f32 %v410_v45, 0.0 }
  0xdb   : > { %v1219_v49 = vpop.f32.mrf.mxu0  ;;  %1252 = vmatmul.mubr.msk.f32.vlgmr.msra.gmra.mxu1 %vm501_vm1, %v474_v44  ;;  %v445_v5 = vadd.f32 %v444_v50, %v278_v35  ;;  %v484_v12 = vmax.f32 %v450_v8, 0.0 }
  0xdc   : > { %v475_v51 = vmax.f32 %v405_v48, 0.0  ;;  %v420_v52 = vadd.f32 %v1219_v49, %v278_v35 }
  0xdd   : > { %v414_v54 = vpop.f32.mrf.mxu0  ;;  %v1231_v55 = vpop.f32.mrf.mxu1  ;;  %v483_v9 = vmax.f32 %v445_v5, 0.0 }
  0xde   : > { %v415_v56 = vadd.f32 %v414_v54, %v278_v35  ;;  %1254 = vmatprep.mubr.msk.f32.mxu1 %vm501_vm1, %v475_v51  ;;  %v478_v57 = vmax.f32 %v420_v52, 0.0  ;;  %v460_v13 = vadd.f32 %v1231_v55, %v278_v35 }
  0xdf   : > { %v1222_v58 = vpop.f32.mrf.mxu0  ;;  %1255 = vmatmul.mubr.msk.f32.gmra.mxu1 %vm501_vm1, %v476_v53  ;;  %v454_v63 = vpop.f32.mrf.mxu1 }
  0xe0   : > { %v477_v59 = vmax.f32 %v415_v56, 0.0  ;;  %v430_v60 = vadd.f32 %v1222_v58, %v278_v35  ;;  %v455_v10 = vadd.f32 %v454_v63, %v278_v35  ;;  %v486_v16 = vmax.f32 %v460_v13, 0.0  ;;  %v1520_v63 = vld [vmem:[%s1617_s4] ss:$0 sm:$0xff] }
  0xe1   : > { %v424_v62 = vpop.f32.mrf.mxu0  ;;  %v1234_v6 = vpop.f32.mrf.mxu1  ;;  %v703_v58 = vsub.s32 2, %v1463_v32 }
  0xe2   : > { %v425_v0 = vadd.f32 %v424_v62, %v278_v35  ;;  %1257 = vmatprep.mubr.msk.f32.mxu1 %vm501_vm1, %v477_v59  ;;  %v480_v1 = vmax.f32 %v430_v60, 0.0  ;;  %v485_v14 = vmax.f32 %v455_v10, 0.0  ;;  %v470_v17 = vadd.f32 %v1234_v6, %v278_v35 }
  0xe3   : > { %1258 = vmatmul.mubr.msk.f32.gmra.mxu1 %vm501_vm1, %v478_v57  ;;  %v464_v11 = vpop.f32.mrf.mxu1  ;;  %v1514_v59 = vrot.slane %v1469_v34, %v703_v58 }
  0xe4   : > { %v479_v3 = vmax.f32 %v425_v0, 0.0  ;;  %v465_v15 = vadd.f32 %v464_v11, %v278_v35  ;;  %v488_v19 = vmax.f32 %v470_v17, 0.0 }
  0xe6   : > { %1260 = vmatprep.mubr.msk.f32.mxu1 %vm501_vm1, %v479_v3  ;;  %v487_v18 = vmax.f32 %v465_v15, 0.0 }
  0xe7   : > { %1261 = vmatmul.mubr.msk.f32.gmra.mxu1 %vm501_vm1, %v480_v1 }
  0xe8   : > { %1263 = vmatprep.mubr.msk.f32.mxu1 %vm501_vm1, %v481_v4 }
  0xeb   : > { %1264 = vmatmul.mubr.msk.f32.gmra.mxu1 %vm501_vm1, %v482_v7 }
  0xec   : > { %1266 = vmatprep.mubr.msk.f32.mxu1 %vm501_vm1, %v483_v9 }
  0xef   : > { %1267 = vmatmul.mubr.msk.f32.gmra.mxu1 %vm501_vm1, %v484_v12 }
  0xf0   : > { %1269 = vmatprep.mubr.msk.f32.mxu1 %vm501_vm1, %v485_v14 }
  0xf3   : > { %1270 = vmatmul.mubr.msk.f32.gmra.mxu1 %vm501_vm1, %v486_v16 }
  0xf4   : > { %1272 = vmatprep.mubr.msk.f32.mxu1 %vm501_vm1, %v487_v18 }
  0xf7   : > { %1273 = vmatmul.mubr.msk.f32.gmra.mxu1 %vm501_vm1, %v488_v19 }
 0x19b   : > { %v1253_v24 = vpop.f32.mrf.mxu1 }
 0x19c   : > { %v622_v27 = vadd.f32 %v1253_v24, %v500_v23 }
 0x19d   : > { %v616_v25 = vpop.f32.mrf.mxu1 }
 0x19e   : > { %v617_v26 = vadd.f32 %v616_v25, %v500_v23 }
 0x19f   : > { %v1256_v28 = vpop.f32.mrf.mxu1 }
 0x1a0   : > { %1287 = vmatprep.mubr.msk.f32.mxu0 %vm705_vm2, %v617_v26  ;;  %v632_v31 = vadd.f32 %v1256_v28, %v500_v23 }
 0x1a1   : > { %v626_v29 = vpop.f32.mrf.mxu1  ;;  %1288 = vmatmul.mubr.msk.f32.vlgmr.msra.gmra.mxu0 %vm705_vm2, %v622_v27 }
 0x1a2   : > { %v627_v30 = vadd.f32 %v626_v29, %v500_v23 }
 0x1a3   : > { %v1259_v33 = vpop.f32.mrf.mxu1 }
 0x1a4   : > { %1290 = vmatprep.mubr.msk.f32.mxu0 %vm705_vm2, %v627_v30  ;;  %v642_v37 = vadd.f32 %v1259_v33, %v500_v23 }
 0x1a5   : > { %v636_v35 = vpop.f32.mrf.mxu1  ;;  %1291 = vmatmul.mubr.msk.f32.gmra.mxu0 %vm705_vm2, %v632_v31 }
 0x1a6   : > { %v637_v36 = vadd.f32 %v636_v35, %v500_v23 }
 0x1a7   : > { %v1262_v38 = vpop.f32.mrf.mxu1 }
 0x1a8   : > { %1293 = vmatprep.mubr.msk.f32.mxu0 %vm705_vm2, %v637_v36  ;;  %v652_v41 = vadd.f32 %v1262_v38, %v500_v23 }
 0x1a9   : > { %v646_v39 = vpop.f32.mrf.mxu1  ;;  %1294 = vmatmul.mubr.msk.f32.gmra.mxu0 %vm705_vm2, %v642_v37 }
 0x1aa   : > { %v647_v40 = vadd.f32 %v646_v39, %v500_v23 }
 0x1ab   : > { %v1265_v42 = vpop.f32.mrf.mxu1 }
 0x1ac   : > { %1296 = vmatprep.mubr.msk.f32.mxu0 %vm705_vm2, %v647_v40  ;;  %v662_v45 = vadd.f32 %v1265_v42, %v500_v23 }
 0x1ad   : > { %v656_v43 = vpop.f32.mrf.mxu1  ;;  %1297 = vmatmul.mubr.msk.f32.gmra.mxu0 %vm705_vm2, %v652_v41 }
 0x1ae   : > { %v657_v44 = vadd.f32 %v656_v43, %v500_v23 }
 0x1af   : > { %v1268_v46 = vpop.f32.mrf.mxu1 }
 0x1b0   : > { %1299 = vmatprep.mubr.msk.f32.mxu0 %vm705_vm2, %v657_v44  ;;  %v672_v49 = vadd.f32 %v1268_v46, %v500_v23 }
 0x1b1   : > { %v666_v47 = vpop.f32.mrf.mxu1  ;;  %1300 = vmatmul.mubr.msk.f32.gmra.mxu0 %vm705_vm2, %v662_v45 }
 0x1b2   : > { %v667_v48 = vadd.f32 %v666_v47, %v500_v23 }
 0x1b3   : > { %v1271_v50 = vpop.f32.mrf.mxu1 }
 0x1b4   : > { %1302 = vmatprep.mubr.msk.f32.mxu0 %vm705_vm2, %v667_v48  ;;  %v682_v53 = vadd.f32 %v1271_v50, %v500_v23 }
 0x1b5   : > { %v676_v51 = vpop.f32.mrf.mxu1  ;;  %1303 = vmatmul.mubr.msk.f32.gmra.mxu0 %vm705_vm2, %v672_v49 }
 0x1b6   : > { %v677_v52 = vadd.f32 %v676_v51, %v500_v23 }
 0x1b7   : > { %v1274_v54 = vpop.f32.mrf.mxu1 }
 0x1b8   : > { %1305 = vmatprep.mubr.msk.f32.mxu0 %vm705_vm2, %v677_v52  ;;  %v692_v57 = vadd.f32 %v1274_v54, %v500_v23 }
 0x1b9   : > { %v686_v55 = vpop.f32.mrf.mxu1  ;;  %1306 = vmatmul.mubr.msk.f32.gmra.mxu0 %vm705_vm2, %v682_v53 }
 0x1ba   : > { %v687_v56 = vadd.f32 %v686_v55, %v500_v23 }
 0x1bc   : > { %1308 = vmatprep.mubr.msk.f32.mxu0 %vm705_vm2, %v687_v56 }
 0x1bd   : > { %1309 = vmatmul.mubr.msk.f32.gmra.mxu0 %vm705_vm2, %v692_v57 }
 0x261   : > { %v1289_v60 = vpop.f32.mrf.mxu0 }
 0x262   : > { %v826_v61 = vadd.f32 %v1289_v60, %v1514_v59 }
 0x263   : > { %v820_v62 = vpop.f32.mrf.mxu0 }
 0x264   : > { %v900_v0 = vmax.f32 %v826_v61, 0.0  ;;  %v821_v1 = vadd.f32 %v820_v62, %v1514_v59 }
 0x265   : > { %v1292_v2 = vpop.f32.mrf.mxu0 }
 0x266   : > { %v899_v3 = vmax.f32 %v821_v1, 0.0  ;;  %v836_v4 = vadd.f32 %v1292_v2, %v1514_v59  ;;  %v923_v5 = vmul.f32 %v1520_v63, %v900_v0 }
 0x267   : > { %v830_v6 = vpop.f32.mrf.mxu0 }
 0x268   : > { %v902_v7 = vmax.f32 %v836_v4, 0.0  ;;  %v831_v8 = vadd.f32 %v830_v6, %v1514_v59  ;;  %v942_v9 = vsel %vm938_vm3, %v923_v5, 0.0  ;;  %v922_v10 = vmul.f32 %v1520_v63, %v899_v3 }
 0x269   : > { %943 = vadd.xlane.f32.xlu0 %v942_v9  ;;  %v1295_v11 = vpop.f32.mrf.mxu0 }
 0x26a   : > { %v901_v12 = vmax.f32 %v831_v8, 0.0  ;;  %v846_v13 = vadd.f32 %v1295_v11, %v1514_v59  ;;  %v925_v14 = vmul.f32 %v1520_v63, %v902_v7  ;;  %v939_v16 = vsel %vm938_vm3, %v922_v10, 0.0 }
 0x26b   : > { %v840_v15 = vpop.f32.mrf.mxu0 }
 0x26c   : > { %v904_v17 = vmax.f32 %v846_v13, 0.0  ;;  %v841_v18 = vadd.f32 %v840_v15, %v1514_v59  ;;  %v948_v19 = vsel %vm938_vm3, %v925_v14, 0.0  ;;  %v924_v20 = vmul.f32 %v1520_v63, %v901_v12 }
 0x26d   : > { %949 = vadd.xlane.f32.xlu1 %v948_v19  ;;  %v1298_v21 = vpop.f32.mrf.mxu0  ;;  %940 = vadd.xlane.f32.xlu0 %v939_v16  ;;  %v989_v16 = vsub.s32 3, %v1463_v32 }
 0x26e   : > { %v903_v22 = vmax.f32 %v841_v18, 0.0  ;;  %v856_v23 = vadd.f32 %v1298_v21, %v1514_v59  ;;  %v945_v25 = vsel %vm938_vm3, %v924_v20, 0.0  ;;  %v927_v29 = vmul.f32 %v1520_v63, %v904_v17 }
 0x26f   : > { %v850_v24 = vpop.f32.mrf.mxu0  ;;  %v990_v17 = vrot.slane %v1469_v34, %v989_v16 }
 0x270   : > { %v906_v26 = vmax.f32 %v856_v23, 0.0  ;;  %v851_v27 = vadd.f32 %v850_v24, %v1514_v59  ;;  %v926_v28 = vmul.f32 %v1520_v63, %v903_v22  ;;  %v954_v40 = vsel %vm938_vm3, %v927_v29, 0.0 }
 0x271   : > { %v1301_v30 = vpop.f32.mrf.mxu0  ;;  %946 = vadd.xlane.f32.xlu1 %v945_v25 }
 0x272   : > { %v905_v31 = vmax.f32 %v851_v27, 0.0  ;;  %v866_v33 = vadd.f32 %v1301_v30, %v1514_v59  ;;  %v951_v35 = vsel %vm938_vm3, %v926_v28, 0.0  ;;  %v929_v37 = vmul.f32 %v1520_v63, %v906_v26 }
 0x273   : > { %v860_v36 = vpop.f32.mrf.mxu0  ;;  %952 = vadd.xlane.f32.xlu0 %v951_v35 }
 0x274   : > { %v908_v38 = vmax.f32 %v866_v33, 0.0  ;;  %v861_v39 = vadd.f32 %v860_v36, %v1514_v59  ;;  %v928_v41 = vmul.f32 %v1520_v63, %v905_v31  ;;  %v960_v47 = vsel %vm938_vm3, %v929_v37, 0.0 }
 0x275   : > { %v1304_v42 = vpop.f32.mrf.mxu0  ;;  %955 = vadd.xlane.f32.xlu1 %v954_v40 }
 0x276   : > { %v907_v43 = vmax.f32 %v861_v39, 0.0  ;;  %v876_v44 = vadd.f32 %v1304_v42, %v1514_v59  ;;  %v957_v45 = vsel %vm938_vm3, %v928_v41, 0.0  ;;  %v931_v51 = vmul.f32 %v1520_v63, %v908_v38 }
 0x277   : > { %v870_v46 = vpop.f32.mrf.mxu0  ;;  %958 = vadd.xlane.f32.xlu0 %v957_v45 }
 0x278   : > { %v910_v48 = vmax.f32 %v876_v44, 0.0  ;;  %v871_v49 = vadd.f32 %v870_v46, %v1514_v59  ;;  %v930_v50 = vmul.f32 %v1520_v63, %v907_v43  ;;  %v966_v61 = vsel %vm938_vm3, %v931_v51, 0.0 }
 0x279   : > { %v1307_v52 = vpop.f32.mrf.mxu0  ;;  %961 = vadd.xlane.f32.xlu1 %v960_v47 }
 0x27a   : > { %v909_v53 = vmax.f32 %v871_v49, 0.0  ;;  %v886_v54 = vadd.f32 %v1307_v52, %v1514_v59  ;;  %v963_v55 = vsel %vm938_vm3, %v930_v50, 0.0  ;;  %v933_v57 = vmul.f32 %v1520_v63, %v910_v48 }
 0x27b   : > { %v880_v56 = vpop.f32.mrf.mxu0  ;;  %964 = vadd.xlane.f32.xlu0 %v963_v55 }
 0x27c   : > { %v912_v58 = vmax.f32 %v886_v54, 0.0  ;;  %v881_v60 = vadd.f32 %v880_v56, %v1514_v59  ;;  %v932_v62 = vmul.f32 %v1520_v63, %v909_v53  ;;  %v972_v5 = vsel %vm938_vm3, %v933_v57, 0.0 }
 0x27d   : > { %v1310_v0 = vpop.f32.mrf.mxu0  ;;  %967 = vadd.xlane.f32.xlu1 %v966_v61 }
 0x27e   : > { %v911_v1 = vmax.f32 %v881_v60, 0.0  ;;  %v896_v2 = vadd.f32 %v1310_v0, %v1514_v59  ;;  %v969_v3 = vsel %vm938_vm3, %v932_v62, 0.0  ;;  %v935_v9 = vmul.f32 %v1520_v63, %v912_v58 }
 0x27f   : > { %v890_v4 = vpop.f32.mrf.mxu0  ;;  %970 = vadd.xlane.f32.xlu0 %v969_v3 }
 0x280   : > { %v914_v6 = vmax.f32 %v896_v2, 0.0  ;;  %v891_v7 = vadd.f32 %v890_v4, %v1514_v59  ;;  %v934_v8 = vmul.f32 %v1520_v63, %v911_v1  ;;  %v978_v12 = vsel %vm938_vm3, %v935_v9, 0.0 }
 0x281   : > { %973 = vadd.xlane.f32.xlu1 %v972_v5 }
 0x282   : > { %v913_v10 = vmax.f32 %v891_v7, 0.0  ;;  %v975_v11 = vsel %vm938_vm3, %v934_v8, 0.0  ;;  %v937_v14 = vmul.f32 %v1520_v63, %v914_v6 }
 0x283   : > { %976 = vadd.xlane.f32.xlu0 %v975_v11 }
 0x284   : > { %v936_v13 = vmul.f32 %v1520_v63, %v913_v10  ;;  %v984_v59 = vsel %vm938_vm3, %v937_v14, 0.0 }
 0x285   : > { %979 = vadd.xlane.f32.xlu1 %v978_v12 }
 0x286   : > { %v981_v15 = vsel %vm938_vm3, %v936_v13, 0.0 }
 0x287   : > { %982 = vadd.xlane.f32.xlu0 %v981_v15 }
 0x289   : > { %985 = vadd.xlane.f32.xlu1 %v984_v59 }
 0x2f2   : > { %v944_v63 = vpop.xlane.xlu0 %943 }
 0x2f3   : > { %v992_v18 = vadd.f32 %v990_v17, %v944_v63 }
 0x2f5   : > { %1009 = vst.msk [vmem:[%s1576_s24 + $0x8] sm:$0xff] %vm1007_vm4, %v992_v18 }
 0x2f6   : > { %v950_v32 = vpop.xlane.xlu1 %949  ;;  %v941_v19 = vpop.xlane.xlu0 %940 }
 0x2f7   : > { %v994_v34 = vadd.f32 %v990_v17, %v950_v32  ;;  %v991_v20 = vadd.f32 %v990_v17, %v941_v19 }
 0x2f9   : > { %1011 = vst.msk [vmem:[%s1576_s24 + $0x18] sm:$0xff] %vm1007_vm4, %v994_v34  ;;  %1008 = vst.msk [vmem:[%s1576_s24] sm:$0xff] %vm1007_vm4, %v991_v20 }
 0x2fa   : > { %v947_v21 = vpop.xlane.xlu1 %946 }
 0x2fb   : > { %v993_v22 = vadd.f32 %v990_v17, %v947_v21 }
 0x2fc   : > { %v953_v23 = vpop.xlane.xlu0 %952 }
 0x2fd   : > { %1010 = vst.msk [vmem:[%s1576_s24 + $0x10] sm:$0xff] %vm1007_vm4, %v993_v22  ;;  %v995_v24 = vadd.f32 %v990_v17, %v953_v23 }
 0x2fe   : > { %v956_v25 = vpop.xlane.xlu1 %955 }
 0x2ff   : > { %1012 = vst.msk [vmem:[%s1576_s24 + $0x20] sm:$0xff] %vm1007_vm4, %v995_v24  ;;  %v996_v26 = vadd.f32 %v990_v17, %v956_v25 }
 0x300   : > { %v959_v27 = vpop.xlane.xlu0 %958 }
 0x301   : > { %1013 = vst.msk [vmem:[%s1576_s24 + $0x28] sm:$0xff] %vm1007_vm4, %v996_v26  ;;  %v997_v28 = vadd.f32 %v990_v17, %v959_v27 }
 0x302   : > { %v962_v29 = vpop.xlane.xlu1 %961 }
 0x303   : > { %1014 = vst.msk [vmem:[%s1576_s24 + $0x30] sm:$0xff] %vm1007_vm4, %v997_v28  ;;  %v998_v30 = vadd.f32 %v990_v17, %v962_v29 }
 0x304   : > { %v965_v31 = vpop.xlane.xlu0 %964 }
 0x305   : > { %1015 = vst.msk [vmem:[%s1576_s24 + $0x38] sm:$0xff] %vm1007_vm4, %v998_v30  ;;  %v999_v33 = vadd.f32 %v990_v17, %v965_v31 }
 0x306   : > { %v968_v35 = vpop.xlane.xlu1 %967 }
 0x307   : > { %1016 = vst.msk [vmem:[%s1576_s24 + $0x40] sm:$0xff] %vm1007_vm4, %v999_v33  ;;  %v1000_v36 = vadd.f32 %v990_v17, %v968_v35 }
 0x308   : > { %v971_v37 = vpop.xlane.xlu0 %970 }
 0x309   : > { %1017 = vst.msk [vmem:[%s1576_s24 + $0x48] sm:$0xff] %vm1007_vm4, %v1000_v36  ;;  %v1001_v38 = vadd.f32 %v990_v17, %v971_v37 }
 0x30a   : > { %v974_v39 = vpop.xlane.xlu1 %973 }
 0x30b   : > { %1018 = vst.msk [vmem:[%s1576_s24 + $0x50] sm:$0xff] %vm1007_vm4, %v1001_v38  ;;  %v1002_v40 = vadd.f32 %v990_v17, %v974_v39 }
 0x30c   : > { %v977_v41 = vpop.xlane.xlu0 %976 }
 0x30d   : > { %1019 = vst.msk [vmem:[%s1576_s24 + $0x58] sm:$0xff] %vm1007_vm4, %v1002_v40  ;;  %v1003_v42 = vadd.f32 %v990_v17, %v977_v41 }
 0x30e   : > { %v980_v43 = vpop.xlane.xlu1 %979 }
 0x30f   : > { %1020 = vst.msk [vmem:[%s1576_s24 + $0x60] sm:$0xff] %vm1007_vm4, %v1003_v42  ;;  %v1004_v44 = vadd.f32 %v990_v17, %v980_v43 }
 0x310   : > { %v983_v45 = vpop.xlane.xlu0 %982 }
 0x311   : > { %1021 = vst.msk [vmem:[%s1576_s24 + $0x68] sm:$0xff] %vm1007_vm4, %v1004_v44  ;;  %v1005_v46 = vadd.f32 %v990_v17, %v983_v45 }
 0x312   : > { %v986_v47 = vpop.xlane.xlu1 %985 }
 0x313   : > { %1022 = vst.msk [vmem:[%s1576_s24 + $0x70] sm:$0xff] %vm1007_vm4, %v1005_v46  ;;  %v1006_v48 = vadd.f32 %v990_v17, %v986_v47 }
 0x315   : > { %1023 = vst.msk [vmem:[%s1576_s24 + $0x78] sm:$0xff] %vm1007_vm4, %v1006_v48 }
 0x316 PF: > { %s16_s21 = sadd.s32 1, %s1331_s21  }
 0x317   : > { %p13_p4 = scmp.ge.s32.totalorder %s16_s21, 4  }
 0x319   :  { %15 = sbr.rel (!%p13_p4) target bundleno = 1 (0x1), region = 74 }

</bundles_post_ra>
